<compile_context>
chip_gen: v6e
topology: v6e:2x2x1
jax: 0.10.0
libtpu: 0.0.40
codegen_flags: <defaults>
</compile_context>

<pallas_src>
import functools
import math

import jax
import jax.numpy as jnp
from jax import lax
from jax.experimental import pallas as pl
from jax.experimental.pallas import tpu as pltpu

_VMEM_LIMIT = 64 * 1024 * 1024  # raised scoped-VMEM cap so bigger row tiles fit


# ----------------------------------------------------------------------------- #
# tiling helpers
# ----------------------------------------------------------------------------- #
def _pick_tile(dim, prefs, min_grid=1):
    """Largest preferred tile that divides `dim`; prefer one leaving >= min_grid
    grid steps (megacore sharding).  Falls back to the full extent (always legal)
    for small/odd dims."""
    for p in prefs:
        if dim % p == 0 and dim // p >= min_grid:
            return p
    for p in prefs:
        if dim % p == 0:
            return p
    return dim


def _attn_block(N, L, E, H, budget_bytes=16 * 1024 * 1024, max_unroll=64):
    """Pick the attention n-block: must divide N and be a multiple of 8 (or == N),
    capped by a rough f32 VMEM budget and by head-loop unroll size."""
    cands = [d for d in range(1, N + 1)
             if N % d == 0 and (d % 8 == 0 or d == N)]
    best = cands[0]
    for d in cands:
        vmem = 4 * (3 * L * d * 3 * E + 2 * L * d * E + H * L * L)
        if vmem <= budget_bytes and d * H <= max_unroll:
            best = max(best, d)
    return best


def _pad_out_features(w, b, multiple=128):
    """Zero-pad a (N, K) weight / (N,) bias along N to a lane-dense multiple."""
    n = w.shape[0]
    n_pad = ((n + multiple - 1) // multiple) * multiple
    if n_pad == n:
        return w, b
    w_p = jnp.concatenate([w, jnp.zeros((n_pad - n, w.shape[1]), w.dtype)], axis=0)
    b_p = jnp.concatenate([b, jnp.zeros((n_pad - n,), b.dtype)], axis=0)
    return w_p, b_p


# ----------------------------------------------------------------------------- #
# Kernel 1: fused matmul  y = x @ W + b  (+ ReLU) (+ residual add) (+ LayerNorm)
#   W is already (K, N); contraction feeds the MXU its natural layout.
#   NOTE: the K-reduction must stay the LAST (innermost) grid axis, otherwise the
#   k==0 init / k==last store pattern silently breaks.
# ----------------------------------------------------------------------------- #
def _fused_linear_kernel(*refs, activation, has_add, has_ln, eps):
    x_ref, w_ref, b_ref = refs[0], refs[1], refs[2]
    pos = 3
    if has_add:
        add_ref = refs[pos]
        pos += 1
    if has_ln:
        g_ref, bet_ref = refs[pos], refs[pos + 1]
        pos += 2
    o_ref = refs[pos]
    acc_ref = refs[pos + 1]

    k = pl.program_id(2)

    @pl.when(k == 0)
    def _():
        # Fold bias into the accumulator init.
        acc_ref[...] = jnp.broadcast_to(
            b_ref[...].astype(jnp.float32), acc_ref.shape)

    acc_ref[...] += lax.dot_general(
        x_ref[...], w_ref[...],
        dimension_numbers=(((1,), (0,)), ((), ())),
        preferred_element_type=jnp.float32)

    @pl.when(k == pl.num_programs(2) - 1)
    def _():
        y = acc_ref[...]
        if activation == "relu":
            y = jnp.maximum(y, 0.0)
        if has_add:
            y = y + add_ref[...].astype(jnp.float32)
        if has_ln:
            # single-pass mean / variance (sum and sum of squares)
            inv_n = 1.0 / y.shape[-1]
            s1 = jnp.sum(y, axis=-1, keepdims=True)
            s2 = jnp.sum(y * y, axis=-1, keepdims=True)
            mu = s1 * inv_n
            var = s2 * inv_n - mu * mu
            y = (y - mu) * lax.rsqrt(var + eps)
            y = y * g_ref[...].astype(jnp.float32) + bet_ref[...].astype(jnp.float32)
        o_ref[...] = y.astype(o_ref.dtype)


def fused_linear(x, w_t, b, add=None, ln=None, activation=None):
    """y = x @ w_t + b, x:(M,K), w_t:(K,N) pre-transposed, b:(N,) -> (M,N).
    Optional fused ReLU, residual add (M,N) and LayerNorm over N (requires the
    output block to span the full feature dim)."""
    M, K = x.shape
    K2, N = w_t.shape
    assert K == K2
    has_add = add is not None
    has_ln = ln is not None

    tm = _pick_tile(M, (512, 256, 128, 64, 32, 16, 8), min_grid=2)
    tn = N if has_ln else _pick_tile(N, (512, 256, 128))
    tk = _pick_tile(K, (512, 256, 128))

    inputs = [x, w_t, b.reshape(1, N)]
    in_specs = [
        pl.BlockSpec((tm, tk), lambda i, j, k: (i, k)),   # x tile
        pl.BlockSpec((tk, tn), lambda i, j, k: (k, j)),   # W tile (K, N layout)
        pl.BlockSpec((1, tn), lambda i, j, k: (0, j)),    # bias
    ]
    eps = 0.0
    if has_add:
        inputs.append(add)
        in_specs.append(pl.BlockSpec((tm, tn), lambda i, j, k: (i, j)))
    if has_ln:
        g, beta, eps = ln
        inputs += [g.reshape(1, N), beta.reshape(1, N)]
        in_specs += [pl.BlockSpec((1, tn), lambda i, j, k: (0, j)),
                     pl.BlockSpec((1, tn), lambda i, j, k: (0, j))]

    kernel = functools.partial(_fused_linear_kernel, activation=activation,
                               has_add=has_add, has_ln=has_ln, eps=eps)
    return pl.pallas_call(
        kernel,
        out_shape=jax.ShapeDtypeStruct((M, N), x.dtype),
        grid_spec=pltpu.PrefetchScalarGridSpec(
            num_scalar_prefetch=0,
            grid=(M // tm, N // tn, K // tk),   # K reduction innermost (required)
            in_specs=in_specs,
            out_specs=pl.BlockSpec((tm, tn), lambda i, j, k: (i, j)),
            scratch_shapes=[pltpu.VMEM((tm, tn), jnp.float32)],
        ),
        compiler_params=pltpu.CompilerParams(
            dimension_semantics=("parallel", "parallel", "arbitrary"),
            vmem_limit_bytes=_VMEM_LIMIT),
    )(*inputs)


# ----------------------------------------------------------------------------- #
# Kernel 2: fused FFN  LN2( x + lin2( relu( lin1(x) ) ) )
#   The (tm, dim_ff) intermediate stays in VMEM; weights are resident (constant
#   index map -> fetched once).
# ----------------------------------------------------------------------------- #
def _ffn_kernel(x_ref, w1_ref, b1_ref, w2_ref, b2_ref, g_ref, bet_ref, o_ref, *, eps):
    x = x_ref[...].astype(jnp.float32)                               # (tm, D)
    f = lax.dot_general(x, w1_ref[...].astype(jnp.float32),
                        dimension_numbers=(((1,), (0,)), ((), ())),
                        preferred_element_type=jnp.float32)          # (tm, F)
    f = jnp.maximum(f + b1_ref[...].astype(jnp.float32), 0.0)
    y = lax.dot_general(f, w2_ref[...].astype(jnp.float32),
                        dimension_numbers=(((1,), (0,)), ((), ())),
                        preferred_element_type=jnp.float32)          # (tm, D)
    y = y + b2_ref[...].astype(jnp.float32) + x                      # bias + residual
    inv_n = 1.0 / y.shape[-1]
    s1 = jnp.sum(y, axis=-1, keepdims=True)
    s2 = jnp.sum(y * y, axis=-1, keepdims=True)
    mu = s1 * inv_n
    var = s2 * inv_n - mu * mu
    y = (y - mu) * lax.rsqrt(var + eps)
    y = y * g_ref[...].astype(jnp.float32) + bet_ref[...].astype(jnp.float32)
    o_ref[...] = y.astype(o_ref.dtype)


def ffn_ln_fused(x, w1_t, b1, w2_t, b2, gamma, beta, eps):
    M, D = x.shape
    D2, F = w1_t.shape
    assert D == D2 and w2_t.shape == (F, D)
    tm = _pick_tile(M, (256, 128, 64, 32, 16, 8), min_grid=2)
    return pl.pallas_call(
        functools.partial(_ffn_kernel, eps=eps),
        out_shape=jax.ShapeDtypeStruct((M, D), x.dtype),
        grid_spec=pltpu.PrefetchScalarGridSpec(
            num_scalar_prefetch=0,
            grid=(M // tm,),
            in_specs=[
                pl.BlockSpec((tm, D), lambda i: (i, 0)),
                pl.BlockSpec((D, F), lambda i: (0, 0)),
                pl.BlockSpec((1, F), lambda i: (0, 0)),
                pl.BlockSpec((F, D), lambda i: (0, 0)),
                pl.BlockSpec((1, D), lambda i: (0, 0)),
                pl.BlockSpec((1, D), lambda i: (0, 0)),
                pl.BlockSpec((1, D), lambda i: (0, 0)),
            ],
            out_specs=pl.BlockSpec((tm, D), lambda i: (i, 0)),
        ),
        compiler_params=pltpu.CompilerParams(
            dimension_semantics=("parallel",),
            vmem_limit_bytes=_VMEM_LIMIT),
    )(x, w1_t, b1.reshape(1, F), w2_t, b2.reshape(1, D),
      gamma.reshape(1, D), beta.reshape(1, D))


# ----------------------------------------------------------------------------- #
# Kernel 3: multi-head self-attention reading the fused qkv buffer directly.
#   Input block (L, nb, 3E) is a plain rectangular window of the (L, N, 3E) qkv
#   projection output (no wrapper transpose / HBM copy); output is written as a
#   lane-dense (L, nb, E) slab.  Head split is done in-kernel with static slices.
#   Softmax normalization is deferred to the (L, Dh) output (not the (L, L) probs).
# ----------------------------------------------------------------------------- #
def _attn_kernel(qkv_ref, o_ref, *, n_heads, d_head, scale):
    L, nb, _ = qkv_ref.shape
    E = n_heads * d_head
    x = qkv_ref[...].astype(jnp.float32)                       # (L, nb, 3E)
    for n in range(nb):
        xn = x[:, n, :]                                        # (L, 3E)
        for h in range(n_heads):
            q = xn[:, h * d_head:(h + 1) * d_head] * scale             # (L, Dh)
            k = xn[:, E + h * d_head:E + (h + 1) * d_head]
            v = xn[:, 2 * E + h * d_head:2 * E + (h + 1) * d_head]
            s = lax.dot_general(q, k, (((1,), (1,)), ((), ())),
                                preferred_element_type=jnp.float32)    # (L, L)
            m = jnp.max(s, axis=-1, keepdims=True)
            p = jnp.exp(s - m)
            den = jnp.sum(p, axis=-1, keepdims=True)
            o = lax.dot_general(p, v, (((1,), (0,)), ((), ())),
                                preferred_element_type=jnp.float32)    # (L, Dh)
            # deferred normalization (divide Dh columns, not L);
            # approx=True would move this to the EUP, kept exact for parity.
            o = o * pl.reciprocal(den, approx=False)
            o_ref[:, n:n + 1, h * d_head:(h + 1) * d_head] = \
                o[:, None, :].astype(o_ref.dtype)


def attention_pallas(qkv3, n_heads, d_head, scale):
    """qkv3: (L, N, 3E) fused projection output -> attention output (L, N, E)."""
    L, N, threeE = qkv3.shape
    E = n_heads * d_head
    assert threeE == 3 * E
    nb = _attn_block(N, L, E, n_heads)
    return pl.pallas_call(
        functools.partial(_attn_kernel, n_heads=n_heads, d_head=d_head, scale=scale),
        out_shape=jax.ShapeDtypeStruct((L, N, E), qkv3.dtype),
        grid_spec=pltpu.PrefetchScalarGridSpec(
            num_scalar_prefetch=0,
            grid=(N // nb,),
            in_specs=[pl.BlockSpec((L, nb, 3 * E), lambda i: (0, i, 0))],
            out_specs=pl.BlockSpec((L, nb, E), lambda i: (0, i, 0)),
        ),
        compiler_params=pltpu.CompilerParams(
            dimension_semantics=("parallel",),
            vmem_limit_bytes=_VMEM_LIMIT),
    )(qkv3)


# ----------------------------------------------------------------------------- #
# one-time parameter prep for the Pallas path: pre-transpose weights to (K, N),
# pad fc_out to lane-dense output columns.
# ----------------------------------------------------------------------------- #
def prepare_pallas_params(params):
    p = {k: v for k, v in params.items() if k != "layers"}
    p["ff_wt"] = params["ff_w"].T                              # (input_dim, D)
    w_pad, b_pad = _pad_out_features(params["fco_w"], params["fco_b"], 128)
    p["fco_wt_pad"] = w_pad.T                                  # (D, Npad)
    p["fco_b_pad"] = b_pad
    layers = []
    for lp in params["layers"]:
        l = dict(lp)
        l["in_wt"] = lp["in_w"].T                              # (E, 3E)
        l["out_wt"] = lp["out_w"].T                            # (E, E)
        l["lin1_wt"] = lp["lin1_w"].T                          # (D, F)
        l["lin2_wt"] = lp["lin2_w"].T                          # (F, D)
        layers.append(l)
    p["layers"] = layers
    return p


# --------------------------------- forward ----------------------------------- #
def transformer_encoder_forward(x, params):
    B, S, in_dim = x.shape
    D = params["d_model"]
    H = params["nhead"]
    Dh = D // H
    eps = params["eps"]
    out_dim = params["out_dim"]
    scale = 1.0 / math.sqrt(Dh)

    # input projection; positional-embedding add fused into the matmul epilogue
    pos = jnp.tile(params["pos_emb"][:S], (B, 1))              # (B*S, D), row = b*S+s
    h = fused_linear(x.reshape(B * S, in_dim), params["ff_wt"], params["ff_b"],
                     add=pos)                                  # (B*S, D)

    # batch_first=False literal semantics: L = batch axis, N = seq axis.
    L, N, E = B, S, D
    x2d = h                                                    # (L*N, E)
    for lp in params["layers"]:
        qkv = fused_linear(x2d, lp["in_wt"], lp["in_b"])        # (L*N, 3E)
        a = attention_pallas(qkv.reshape(L, N, 3 * E), H, Dh, scale)   # (L, N, E)
        a = a.reshape(L * N, E)
        # out_proj + residual + LayerNorm1 in a single pallas_call
        h1 = fused_linear(a, lp["out_wt"], lp["out_b"], add=x2d,
                          ln=(lp["ln1_g"], lp["ln1_b"], eps))
        # lin1 + ReLU + lin2 + residual + LayerNorm2 in a single pallas_call
        x2d = ffn_ln_fused(h1, lp["lin1_wt"], lp["lin1_b"],
                           lp["lin2_wt"], lp["lin2_b"],
                           lp["ln2_g"], lp["ln2_b"], eps)

    # lane-dense fc_out (padded output columns), slice back afterwards
    y = fused_linear(x2d, params["fco_wt_pad"], params["fco_b_pad"])
    return y[:, :out_dim].reshape(B, S, out_dim)


# ----------------------------- pure-JAX reference ----------------------------- #
_HI = lax.Precision.HIGHEST


def _ref_ln(x, g, b, eps):
    mu = jnp.mean(x, axis=-1, keepdims=True)
    xc = x - mu
    var = jnp.mean(xc * xc, axis=-1, keepdims=True)
    return xc * lax.rsqrt(var + eps) * g + b


def transformer_encoder_reference(x, params):
    B, S, _ = x.shape
    D = params["d_model"]
    H = params["nhead"]
    Dh = D // H
    eps = params["eps"]
    h = jnp.dot(x, params["ff_w"].T, precision=_HI) + params["ff_b"]
    h = h + params["pos_emb"][:S][None, :, :]
    L, N, E = h.shape
    scale = 1.0 / math.sqrt(Dh)
    x2d = h.reshape(L * N, E)
    for lp in params["layers"]:
        qkv = jnp.dot(x2d, lp["in_w"].T, precision=_HI) + lp["in_b"]
        q, k, v = jnp.split(qkv, 3, axis=-1)

        def to_heads(t):
            return t.reshape(L, N, H, Dh).transpose(1, 2, 0, 3)   # (N, H, L, Dh)

        qh, kh, vh = to_heads(q) * scale, to_heads(k), to_heads(v)
        s = jnp.einsum("nhld,nhmd->nhlm", qh, kh, precision=_HI)
        p = jax.nn.softmax(s, axis=-1)
        a = jnp.einsum("nhlm,nhmd->nhld", p, vh, precision=_HI)
        a = a.transpose(2, 0, 1, 3).reshape(L * N, E)
        a = jnp.dot(a, lp["out_w"].T, precision=_HI) + lp["out_b"]
        h1 = _ref_ln(x2d + a, lp["ln1_g"], lp["ln1_b"], eps)
        f = jnp.maximum(jnp.dot(h1, lp["lin1_w"].T, precision=_HI) + lp["lin1_b"], 0.0)
        f = jnp.dot(f, lp["lin2_w"].T, precision=_HI) + lp["lin2_b"]
        x2d = _ref_ln(h1 + f, lp["ln2_g"], lp["ln2_b"], eps)
    out = jnp.dot(x2d, params["fco_w"].T, precision=_HI) + params["fco_b"]
    return out.reshape(B, S, params["out_dim"])


# ------------------------------- initialization ------------------------------- #
def init_params(key, *, input_dim, out_dim, seq_len, d_model, nhead,
                num_layers, dim_ff):
    def linear_init(k, fan_out, fan_in):
        k1, k2 = jax.random.split(k)
        bound = 1.0 / math.sqrt(fan_in)
        w = jax.random.uniform(k1, (fan_out, fan_in), jnp.float32, -bound, bound)
        b = jax.random.uniform(k2, (fan_out,), jnp.float32, -bound, bound)
        return w, b

    keys = jax.random.split(key, 3 + num_layers)
    params = {"d_model": d_model, "nhead": nhead, "out_dim": out_dim, "eps": 1e-5}
    params["pos_emb"] = jax.random.normal(keys[0], (seq_len, d_model), jnp.float32)
    params["ff_w"], params["ff_b"] = linear_init(keys[1], d_model, input_dim)
    params["fco_w"], params["fco_b"] = linear_init(keys[2], out_dim, d_model)

    layers = []
    for n in range(num_layers):
        ks = jax.random.split(keys[3 + n], 4)
        lp = {}
        lp["in_w"], lp["in_b"] = linear_init(ks[0], 3 * d_model, d_model)
        lp["out_w"], lp["out_b"] = linear_init(ks[1], d_model, d_model)
        lp["lin1_w"], lp["lin1_b"] = linear_init(ks[2], dim_ff, d_model)
        lp["lin2_w"], lp["lin2_b"] = linear_init(ks[3], d_model, dim_ff)
        lp["ln1_g"] = jnp.ones((d_model,), jnp.float32)
        lp["ln1_b"] = jnp.zeros((d_model,), jnp.float32)
        lp["ln2_g"] = jnp.ones((d_model,), jnp.float32)
        lp["ln2_b"] = jnp.zeros((d_model,), jnp.float32)
        layers.append(lp)
    params["layers"] = layers
    return params


# ------------------------------------ main ------------------------------------ #
if __name__ == "__main__":
    key = jax.random.PRNGKey(0)
    kp, kx = jax.random.split(key)

    # Small shapes consistent with the module's forward.
    batch, seq_len, input_dim = 2, 8, 16
    d_model, nhead, num_layers, dim_ff, out_dim = 32, 4, 2, 64, 10

    params = init_params(kp, input_dim=input_dim, out_dim=out_dim,
                         seq_len=seq_len, d_model=d_model, nhead=nhead,
                         num_layers=num_layers, dim_ff=dim_ff)
    pallas_params = prepare_pallas_params(params)
    x = jax.random.normal(kx, (batch, seq_len, input_dim), jnp.float32)

    y = transformer_encoder_forward(x, pallas_params)
    y = jax.block_until_ready(y)
    assert y.shape == (batch, seq_len, out_dim)

    y_ref = transformer_encoder_reference(x, params)
    max_diff = float(jnp.max(jnp.abs(y - y_ref)))
    assert jnp.allclose(y, y_ref, atol=2e-3, rtol=2e-3), \
        f"mismatch vs reference, max abs diff = {max_diff}"

    print("KERNEL_OK")
</pallas_src>

<mosaic_0001>
module attributes {stable_mosaic.version = 11 : i64} {
  func.func @_fused_linear_kernel(%arg0: i32, %arg1: i32, %arg2: i32, %arg3: memref<8x16xf32, #tpu.memory_space<vmem>>, %arg4: memref<16x32xf32, #tpu.memory_space<vmem>>, %arg5: memref<1x32xf32, #tpu.memory_space<vmem>>, %arg6: memref<8x32xf32, #tpu.memory_space<vmem>>, %arg7: memref<8x32xf32, #tpu.memory_space<vmem>>, %arg8: memref<8x32xf32, #tpu.memory_space<vmem>>) attributes {dimension_semantics = [#tpu.dimension_semantics<parallel>, #tpu.dimension_semantics<parallel>, #tpu.dimension_semantics<arbitrary>], iteration_bounds = array<i64: 2, 1, 1>, scalar_prefetch = 0 : i64, scratch_operands = 1 : i64, tpu.core_type = #tpu.core_type<tc>, window_params = [{transform_indices = @transform_0, window_bounds = array<i64: 8, 16>}, {transform_indices = @transform_1, window_bounds = array<i64: 16, 32>}, {transform_indices = @transform_2, window_bounds = array<i64: 1, 32>}, {transform_indices = @transform_3, window_bounds = array<i64: 8, 32>}, {transform_indices = @transform_4, window_bounds = array<i64: 8, 32>}]} {
    %c0_i32 = arith.constant 0 : i32
    %0 = arith.cmpi eq, %arg2, %c0_i32 : i32
    %1 = arith.extui %0 : i1 to i32
    %c0_i32_0 = arith.constant 0 : i32
    %2 = arith.cmpi ne, %1, %c0_i32_0 : i32
    scf.if %2 {
      %c0_10 = arith.constant 0 : index
      %c0_11 = arith.constant 0 : index
      %12 = vector.load %arg5[%c0_10, %c0_11] : memref<1x32xf32, #tpu.memory_space<vmem>>, vector<1x32xf32>
      %13 = vector.shape_cast %12 : vector<1x32xf32> to vector<1x32xf32>
      %14 = vector.broadcast %13 : vector<1x32xf32> to vector<8x32xf32>
      %c0_12 = arith.constant 0 : index
      %c0_13 = arith.constant 0 : index
      %15 = vector.load %arg8[%c0_12, %c0_13] : memref<8x32xf32, #tpu.memory_space<vmem>>, vector<8x32xf32>
      tpu.vector_store %arg8[%c0_12, %c0_13], %14 {strides = array<i32>} : memref<8x32xf32, #tpu.memory_space<vmem>>, vector<8x32xf32>,
    } else {
    }
    %c0 = arith.constant 0 : index
    %c0_1 = arith.constant 0 : index
    %3 = vector.load %arg8[%c0, %c0_1] : memref<8x32xf32, #tpu.memory_space<vmem>>, vector<8x32xf32>
    %c0_2 = arith.constant 0 : index
    %c0_3 = arith.constant 0 : index
    %4 = vector.load %arg3[%c0_2, %c0_3] : memref<8x16xf32, #tpu.memory_space<vmem>>, vector<8x16xf32>
    %c0_4 = arith.constant 0 : index
    %c0_5 = arith.constant 0 : index
    %5 = vector.load %arg4[%c0_4, %c0_5] : memref<16x32xf32, #tpu.memory_space<vmem>>, vector<16x32xf32>
    %cst = arith.constant dense<0.000000e+00> : vector<8x32xf32>
    %6 = tpu.matmul %4, %5, %cst {dimension_numbers = #tpu.dot_dimension_numbers<[1], [0], [0], [1], [0, 0, 1, 1], [], []>} : vector<8x16xf32>, vector<16x32xf32>, vector<8x32xf32> -> vector<8x32xf32>
    %7 = arith.addf %3, %6 : vector<8x32xf32>
    %c0_6 = arith.constant 0 : index
    %c0_7 = arith.constant 0 : index
    %8 = vector.load %arg8[%c0_6, %c0_7] : memref<8x32xf32, #tpu.memory_space<vmem>>, vector<8x32xf32>
    tpu.vector_store %arg8[%c0_6, %c0_7], %7 {strides = array<i32>} : memref<8x32xf32, #tpu.memory_space<vmem>>, vector<8x32xf32>,
    %c0_i32_8 = arith.constant 0 : i32
    %9 = arith.cmpi eq, %arg2, %c0_i32_8 : i32
    %10 = arith.extui %9 : i1 to i32
    %c0_i32_9 = arith.constant 0 : i32
    %11 = arith.cmpi ne, %10, %c0_i32_9 : i32
    scf.if %11 {
      %c0_10 = arith.constant 0 : index
      %c0_11 = arith.constant 0 : index
      %12 = vector.load %arg8[%c0_10, %c0_11] : memref<8x32xf32, #tpu.memory_space<vmem>>, vector<8x32xf32>
      %c0_12 = arith.constant 0 : index
      %c0_13 = arith.constant 0 : index
      %13 = vector.load %arg6[%c0_12, %c0_13] : memref<8x32xf32, #tpu.memory_space<vmem>>, vector<8x32xf32>
      %14 = arith.addf %12, %13 : vector<8x32xf32>
      %c0_14 = arith.constant 0 : index
      %c0_15 = arith.constant 0 : index
      %15 = vector.load %arg7[%c0_14, %c0_15] : memref<8x32xf32, #tpu.memory_space<vmem>>, vector<8x32xf32>
      tpu.vector_store %arg7[%c0_14, %c0_15], %14 {strides = array<i32>} : memref<8x32xf32, #tpu.memory_space<vmem>>, vector<8x32xf32>,
    } else {
    }
    return
  }
  func.func @transform_0(%arg0: i32, %arg1: i32, %arg2: i32) -> (i32, i32) {
    %c0_i32 = arith.constant 0 : i32
    return %arg0, %arg2 : i32, i32
  }
  func.func @transform_1(%arg0: i32, %arg1: i32, %arg2: i32) -> (i32, i32) {
    %c0_i32 = arith.constant 0 : i32
    return %arg2, %arg1 : i32, i32
  }
  func.func @transform_2(%arg0: i32, %arg1: i32, %arg2: i32) -> (i32, i32) {
    %c0_i32 = arith.constant 0 : i32
    %c0_i32_0 = arith.constant 0 : i32
    return %c0_i32, %arg1 : i32, i32
  }
  func.func @transform_3(%arg0: i32, %arg1: i32, %arg2: i32) -> (i32, i32) {
    %c0_i32 = arith.constant 0 : i32
    return %arg0, %arg1 : i32, i32
  }
  func.func @transform_4(%arg0: i32, %arg1: i32, %arg2: i32) -> (i32, i32) {
    %c0_i32 = arith.constant 0 : i32
    return %arg0, %arg1 : i32, i32
  }
}

</mosaic_0001>

<bundles_post_ra>
// kernel: tpu_custom_call.1
= control target key start
LH: loop header
LB: loop body
LE: loop exit
PB: predicated region body
PF: predicated region fallthrough
CT: control target
= control target key end

     0   :  { %9 = vsyncpa [#allocation4], 0  ;;  %s1086_s0 = inlined_call_operand.hbm [shape: f32[16,16], index: 0, kind: input, shape index: {}]   ;;  %s1087_s1 = inlined_call_operand.hbm [shape: f32[16,32], index: 1, kind: input, shape index: {}]   ;;  %s1088_s2 = inlined_call_operand.vmem [shape: f32[1,32], index: 2, kind: input, shape index: {}]   ;;  %s1089_s3 = inlined_call_operand.hbm [shape: f32[16,32], index: 3, kind: input, shape index: {}]   ;;  %s1090_s4 = inlined_call_operand.hbm [shape: f32[16,32], index: 4, kind: output, shape index: {}]  }
   0x1   :  { %11 = vsyncpa [#allocation4 + $0x1], 0 }
   0x2   :  { %12 = vsyncpa [#allocation7], 0 }
   0x3   :  { %13 = vsyncpa [#allocation5], 0 }
   0x4   :  { %15 = vsyncpa [#allocation5 + $0x1], 0  ;;  %s879_s15 = smov 0   ;;  %s881_s16 = smov 0  }
   0x5   :  { %s883_s17 = smov 0   ;;  %s885_s18 = smov 0  }
   0x6   :  { %s887_s19 = smov 0   ;;  %s889_s20 = smov 0  }
   0x7 LB: > { %s40_s21 = sadd.s32 1, %s840_s19  ;;  %s49_s22 = sadd.s32 1, %s832_s17  ;;  %s844_s20 = sphi %s889_s20, %s21_s20   ;;  %s840_s19 = sphi %s887_s19, %s1110_s19   ;;  %s836_s18 = sphi %s885_s18, %s1109_s18   ;;  %s832_s17 = sphi %s883_s17, %s1108_s17   ;;  %s828_s16 = sphi %s881_s16, %s1107_s16   ;;  %s824_s15 = sphi %s879_s15, %s1106_s15  }
   0x8   : > { %p42_p0 = scmp.ge.s32.totalorder %s40_s21, 2  ;;  %p56_p1 = scmp.ne.s32.totalorder %s832_s17, %s828_s16 }
   0x9   : > { %p57_p2 = scmp.eq.s32.totalorder %s844_s20, 0  ;;  %p618_p5 = scmp.lt.s32.totalorder %s844_s20, 2 }
   0xa   : > { %s1112_s21 = smov (%p42_p0, %s40_s21), 0  ;;  %s219_s24 = sand.u32 1, %s844_s20  }
   0xb   : > { %p58_p4 = por %p57_p2, %p56_p1  ;;  %s44_s23 = ssub.s32 %s840_s19, %s1112_s21 }
   0xc   : > { %p47_p6 = scmp.eq.s32.totalorder %s44_s23, 0  ;;  %s221_s25 = sand.u32 1, %s832_s17  }
   0xd   : > { %s568_s26 = sshll.u32 %s840_s19, 7  ;;  %s929_s28 = sshll.u32 %s221_s25, 3 }
   0xe   : > { %s927_s27 = scalar_select %p47_p6, %s832_s17, %s49_s22  }
   0xf   : > { %s229_s5 = scalar_lea.hbm %s1086_s0, %s568_s26  ;;  %p936_p7 = pnand %p618_p5, %p58_p4 }
  0x10   : > { %s223_s7 = scalar_lea.vmem [#allocation3], %s929_s28  ;;  %s941_s9 = scalar_lea.sflag [#allocation4], %s219_s24 }
  0x11   : > { %s231_s8 = sshll.u32 %s223_s7, 4  ;;  %p676_p8 = pneg %p936_p7  ;;  %s232_s8 = int_to_ptr.vmem [resolvable:$true] %s231_s8 }
  0x12   : > { %s687_s10 = scalar_lea.vmem %s232_s8, 128  ;;  %s846_s11 = smov [#allocation3]  }
  0x13   : > { %p688_p9 = scmp.ne.s32.totalorder %s232_s8, %s687_s10  ;;  %s692_s12 = sshll.u32 %s846_s11, 4  ;;  %s693_s12 = int_to_ptr.vmem [resolvable:$false] %s692_s12 }
  0x14   : > { %s694_s13 = scalar_lea.vmem %s693_s12, 256  ;;  %p695_p12 = scmp.lt.s32.totalorder %s232_s8, %s693_s12 }
  0x15   : > { %p690_p10 = pnand %p688_p9, %p676_p8  ;;  %p696_p13 = scmp.lt.s32.totalorder %s694_s13, %s687_s10 }
  0x17   : > { %p691_p11 = pneg %p690_p10  ;;  %p697_p0 = por %p696_p13, %p695_p12 }
  0x19   : > { %p698_p2 = pnand %p697_p0, %p691_p11 }
  0x1b   : > { %701 = shalt.err (!%p698_p2)
}
  0x1c   : > { %609 = dma.hbm_to_vmem [thread:$0]  (!%p936_p7), %s229_s5, 128, %s232_s8, %s941_s9  }
  0x1d   : > { %s952_s14 = sadd.s32 4294967295, %s844_s20   ;;  %s562_s22 = sadd.s32 4294967294, %s844_s20  }
  0x1e   : > { %p62_p4 = scmp.ne.s32.totalorder %s828_s16, %s824_s15  ;;  %p1092_p5 = scmp.eq.s32.totalorder %s952_s14, 0 }
  0x1f   : > { %p170_p6 = scmp.eq.s32.totalorder %s952_s14, 1  ;;  %p176_p9 = scmp.eq.s32.totalorder %s562_s22, 1 }
  0x20   : > { %p563_p10 = scmp.ge.s32.totalorder %s844_s20, 1  ;;  %p962_p11 = por %p1092_p5, %p62_p4 }
  0x21   : > { %p969_p12 = por %p170_p6, %p56_p1  ;;  %p973_p13 = por %p176_p9, %p62_p4 }
  0x22   : > { %s1095_s23 = scalar_select %p962_p11, 1, 0 }
  0x23   : > { %s1096_s24 = scalar_select %p969_p12, 1, 0 }
  0x24   : > { %s1097_s25 = scalar_select %p973_p13, 1, 0 }
  0x25   : > { %p183_p0 = scmp.lt.s32.totalorder %s844_s20, 3  ;;  %s847_s30 = smov [#allocation6]  }
  0x26   : > { %s199_s5 = sshll.u32 %s847_s30, 4  ;;  %s248_s10 = scalar_lea.hbm %s1089_s3, %s568_s26  ;;  %s987_s5 = int_to_ptr.vmem [resolvable:$true] %s199_s5 }
  0x27   : > { %p978_p2 = pnand %p563_p10, %p183_p0  ;;  %s242_s11 = scalar_lea.vmem [#allocation8], %s929_s28 }
  0x28   : > { %s250_s12 = sshll.u32 %s242_s11, 4  ;;  %s848_s30 = smov [#allocation8]   ;;  %s251_s12 = int_to_ptr.vmem [resolvable:$true] %s250_s12 }
  0x29   : > { %p602_p1 = pneg %p978_p2  ;;  %s715_s22 = scalar_lea.vmem %s251_s12, 128 }
  0x2a   : > { %p716_p6 = scmp.ne.s32.totalorder %s251_s12, %s715_s22  ;;  %s720_s26 = sshll.u32 %s848_s30, 4  ;;  %s721_s26 = int_to_ptr.vmem [resolvable:$false] %s720_s26 }
  0x2b   : > { %p994_p4 = pnand %p602_p1, %p1092_p5  ;;  %s722_s7 = scalar_lea.vmem %s721_s26, 256 }
  0x2c   : > { %p718_p9 = pnand %p716_p6, %p676_p8  ;;  %p723_p0 = scmp.lt.s32.totalorder %s251_s12, %s721_s26 }
  0x2d   : > { %p724_p3 = scmp.lt.s32.totalorder %s722_s7, %s715_s22 }
  0x2e   : > { %p719_p10 = pneg %p718_p9 }
  0x2f   : > { %p725_p13 = por %p724_p3, %p723_p0 }
  0x31   : > { %p726_p12 = pnand %p725_p13, %p719_p10 }
  0x33   : > { %729 = shalt.err (!%p726_p12)
}
  0x34   : > { %612 = dma.hbm_to_vmem [thread:$0]  (!%p936_p7), %s248_s10, 128, %s251_s12, %s941_s9  }
  0x35   : > { %p732_p8 = pneg %p994_p4  ;;  %s741_s28 = scalar_lea.vmem %s987_s5, 256 }
  0x36   : > { %p742_p1 = scmp.ne.s32.totalorder %s987_s5, %s741_s28  ;;  %p749_p5 = scmp.lt.s32.totalorder %s987_s5, %s987_s5 }
  0x37   : > { %p750_p11 = scmp.lt.s32.totalorder %s741_s28, %s741_s28 }
  0x38   : > { %p744_p6 = pnand %p742_p1, %p732_p8 }
  0x39   : > { %p751_p3 = por %p750_p11, %p749_p5 }
  0x3a   : > { %p745_p9 = pneg %p744_p6 }
  0x3c   : > { %p752_p13 = pnand %p751_p3, %p745_p9 }
  0x3e   : > { %755 = shalt.err (!%p752_p13)
}
  0x3f   : > { %s849_s8 = smov 128   ;;  %s850_s6 = smov 8  }
  0x40   : > { %605 = dma.hbm_to_vmem [thread:$0]  (!%p994_p4), %s1087_s1, 256, %s987_s5, [#allocation7], %s849_s8, %s849_s8, %s850_s6  }
  0x41   : > { %259 = sbr.rel (%p978_p2) target bundleno = 300 (0x12c), region = 36  ;;  %s261_s9 = sand.u32 (!%p978_p2), 1, %s952_s14  }
  0x42   : > { %s263_s10 = sand.u32 (!%p978_p2), 1, %s828_s16   ;;  %s262_s30 = scalar_lea.sflag (!%p978_p2), [#allocation4], %s261_s9 }
  0x43   : > { %s1022_s12 = sshll.u32 (!%p978_p2), %s263_s10, 3  ;;  %p1100_p7 = scmp.ne.s32.totalorder (!%p978_p2), %s1095_s23, 0 }
  0x44   : > { %s265_s26 = scalar_lea.vmem (!%p978_p2), [#allocation3], %s1022_s12 }
  0x46   : > { %807 = dma.done.wait (%p1100_p7), %s262_s30, 128  }
  0x47   : > { %809 = vsyncadd (%p1100_p7), %s262_s30, 4294967168  ;;  %p1101_p5 = scmp.eq.s32.totalorder %s952_s14, 0 }
  0x49   : > { %811 = dma.done.wait (%p1101_p5), [#allocation7], 256   ;;  %p1102_p11 = pmov %p1101_p5 }
  0x4a   : > { %s278_s29 = scalar_lea.vmem [#allocation8], %s1022_s12 }
  0x4b   : > { %813 = vsyncadd (%p1102_p11), [#allocation7], 4294967040 }
  0x4c   : > { %815 = dma.done.wait (%p1100_p7), %s262_s30, 128  }
  0x4d   : > { %817 = vsyncadd (%p1100_p7), %s262_s30, 4294967168  ;;  %v851_v0 = vmov 0.0   ;;  %vm852_vm0 = vmmov 0   ;;  %vm326_vm1 = vcmask 261120   ;;  %v331_v1 = vld [vmem:[#allocation6 + $0x8] sm:$0xff]  ;;  %v330_v2 = vld [vmem:[#allocation6] sm:$0xff] }
  0x4e   : > { %585 = vmatprep.subr.mxu0 %v851_v0  ;;  %589 = vmatprep.mubr.msk.f32.mxu0 %vm852_vm0, %v851_v0  ;;  %v329_v3 = vld [vmem:[%s265_s26] sm:$0xff]  ;;  %vm332_vm2 = vcmask 130048   ;;  %v576_v4 = vld [vmem:[%s1088_s2] ss:$0 sm:$0xff]  ;;  %s579_s23 = sshll.u32 %s836_s18, 7  ;;  %s310_s13 = scalar_lea.vmem [#allocation9], %s1022_s12 }
  0x4f   : > { %586 = vmatpush3.msra.mxu0 %v331_v1  ;;  %327 = vst.msk [vmem:[#allocation2] sm:$0xff] %vm326_vm1, %v576_v4  ;;  %v413_v9 = vld [vmem:[%s278_s29] sm:$0xff]  ;;  %s431_s7 = sshll.u32 %s310_s13, 4  ;;  %s429_s6 = scalar_lea.hbm %s1090_s4, %s579_s23  ;;  %s432_s7 = int_to_ptr.vmem [resolvable:$true] %s431_s7 }
  0x50   : > { %587 = vmatprep.subr.mxu0 %v851_v0  ;;  %s417_s11 = scalar_lea.sflag [#allocation5], %s263_s10  ;;  %s756_s22 = scalar_lea.vmem %s432_s7, 128 }
  0x51   : > { %588 = vmatpush3.msra.mxu0 %v330_v2  ;;  %p757_p12 = scmp.ne.s32.totalorder %s432_s7, %s756_s22  ;;  %p1103_p2 = scmp.ne.s32.totalorder %s1096_s24, 0 }
  0x52   : > { %590 = vmatmul.mubr.msk.f32.vlgmr.msra.gmra.mxu0 %vm332_vm2, %v329_v3  ;;  %s853_s9 = smov [#allocation9]  }
  0x53   : > { %p758_p4 = pnand %p757_p12, %p1103_p2  ;;  %s760_s18 = sshll.u32 %s853_s9, 4  ;;  %s761_s18 = int_to_ptr.vmem [resolvable:$false] %s760_s18 }
  0x54   : > { %s762_s12 = scalar_lea.vmem %s761_s18, 256  ;;  %p763_p0 = scmp.lt.s32.totalorder %s432_s7, %s761_s18 }
  0x55   : > { %p759_p10 = pneg %p758_p4  ;;  %p764_p8 = scmp.lt.s32.totalorder %s762_s12, %s756_s22 }
  0x56   : > { %v328_v5 = vld [vmem:[#allocation2] sm:$0xff] }
  0x57   : > { %p765_p1 = por %p764_p8, %p763_p0 }
  0x59   : > { %p766_p6 = pnand %p765_p1, %p759_p10 }
 0x112   : > { %v402_v6 = vpop.f32.mrf.mxu0 }
 0x113   : > { %v406_v7 = vadd.f32 %v402_v6, %v328_v5 }
 0x114   : > { %v591_v8 = vpop.f32.mrf.mxu0 }
 0x115   : > { %408 = vst.msk [vmem:[#allocation2] sm:$0xff] %vm326_vm1, %v406_v7 }
 0x11c   : > { %v412_v10 = vld [vmem:[#allocation2] sm:$0xff] }
 0x11d   : > { %v414_v11 = vadd.f32 %v413_v9, %v412_v10 }
 0x11f   : > { %415 = vst.msk [vmem:[%s310_s13] sm:$0xff] %vm326_vm1, %v414_v11 }
 0x120   : > { %769 = shalt.err (!%p766_p6)
}
 0x121   : > { %s770_s30 = scalar_lea.hbm %s429_s6, 128  ;;  %s774_s29 = scalar_lea.hbm %s1090_s4, 256 }
 0x122   : > { %p771_p9 = scmp.ne.s32.totalorder %s429_s6, %s770_s30  ;;  %p775_p7 = scmp.lt.s32.totalorder %s429_s6, %s1090_s4 }
 0x123   : > { %p776_p5 = scmp.lt.s32.totalorder %s774_s29, %s770_s30 }
 0x124   : > { %p772_p3 = pnand %p771_p9, %p1103_p2 }
 0x125   : > { %p777_p11 = por %p776_p5, %p775_p7 }
 0x126   : > { %p773_p13 = pneg %p772_p3 }
 0x128   : > { %p778_p12 = pnand %p777_p11, %p773_p13 }
 0x12a   : > { %781 = shalt.err (!%p778_p12)
}
 0x12b   : > { %600 = dma.vmem_to_hbm [thread:$0]  (%p1103_p2), %s432_s7, 128, %s429_s6, %s417_s11  }
 0x12c PF: > { %s443_s23 = sand.u32 1, %s824_s15   ;;  %p1104_p4 = scmp.ne.s32.totalorder %s1097_s25, 0 }
 0x12d   : > { %p1105_p10 = scmp.ge.s32.totalorder %s844_s20, 2  ;;  %s444_s13 = scalar_lea.sflag [#allocation5], %s443_s23 }
 0x12f   : > { %p614_p0 = pnand %p1105_p10, %p1104_p4 }
 0x131   : > { %p615_p8 = pneg %p614_p0 }
 0x133   : > { %819 = dma.done.wait (%p615_p8), %s444_s13, 128  }
 0x134   : > { %821 = vsyncadd (%p615_p8), %s444_s13, 4294967168  ;;  %s21_s20 = sadd.s32 1, %s844_s20   ;;  %s1106_s15 = smov %s828_s16 }
 0x135   : > { %p18_p1 = scmp.ge.s32.totalorder %s21_s20, 4   ;;  %s1107_s16 = smov %s832_s17 }
 0x136   : > { %s1108_s17 = smov %s927_s27  ;;  %s1109_s18 = smov %s840_s19 }
 0x137   : > { %s1110_s19 = smov %s1112_s21  ;;  %20 = sbr.rel (!%p18_p1) target bundleno = 7 (0x7), region = 108 }
 0x13c   :  { %449 = vsyncpa [#allocation4], 1 }
 0x13d   :  { %451 = vsyncpa [#allocation4 + $0x1], 1 }
 0x13e   :  { %452 = vsyncpa [#allocation7], 1 }
 0x13f   :  { %453 = vsyncpa [#allocation5], 1 }
 0x140   :  { %455 = vsyncpa [#allocation5 + $0x1], 1 }

</bundles_post_ra>
